<compile_context>
chip_gen: v5e
topology: v5e:2x2
jax: 0.10.0
libtpu: 0.0.40
codegen_flags: <defaults>
</compile_context>

<pallas_src>
import jax
import jax.numpy as jnp
from jax.experimental import pallas as pl
from jax.experimental.pallas import tpu as pltpu


# --------------------------- kernel 1: depthwise ----------------------------
def _make_dw_kernel(num_taps):
    def kernel(patch_ref, wdw_ref, dw_ref, sum_ref, sumsq_ref):
        # patch_ref: (T, Cin, TP)  wdw_ref: (T, Cin, 1)
        acc = patch_ref[0] * wdw_ref[0]
        for t in range(1, num_taps):
            acc = acc + patch_ref[t] * wdw_ref[t]
        dw_ref[...] = acc                                       # lane-dense
        # partial BatchNorm statistics for this tile (lane reduction on XLU)
        sum_ref[...] = jnp.sum(acc, axis=1, keepdims=True)[None]
        sumsq_ref[...] = jnp.sum(acc * acc, axis=1, keepdims=True)[None]
    return kernel


# ------------------- kernel 2: fused BN-affine + pointwise -------------------
def _pw_kernel(dw_ref, weff_ref, bias_ref, out_ref):
    # (Cout, Cin) @ (Cin, TP) -> (Cout, TP)   (single MXU matmul, wide N)
    y = jnp.dot(weff_ref[...], dw_ref[...],
                preferred_element_type=jnp.float32)
    out_ref[...] = (y + bias_ref[...]).astype(out_ref.dtype)


# --------------------------------- wrapper ----------------------------------
def separable_conv2d_forward(x_nchw, w_dw, w_pw, gamma, beta,
                             *, stride=1, dilation=1, eps=1e-5, tile_p=512):
    """SeparableConv2d forward.

    x_nchw : (B, Cin, H, W) float32
    w_dw   : (Cin, 1, KH, KW)  depthwise conv weight (groups=Cin, no bias)
    w_pw   : (Cout, Cin, 1, 1) pointwise conv weight (no bias)
    gamma, beta : (Cin,) BatchNorm affine params (training-mode batch stats).
    """
    B, Cin, H, W = x_nchw.shape
    KH, KW = int(w_dw.shape[2]), int(w_dw.shape[3])
    Cout = int(w_pw.shape[0])
    T = KH * KW

    # ---- fixed_padding (same arithmetic as the PyTorch helper) ----
    k_eff = KH + (KH - 1) * (dilation - 1)
    pad_total = k_eff - 1
    pad_beg = pad_total // 2
    pad_end = pad_total - pad_beg
    x_pad = jnp.pad(x_nchw, ((0, 0), (0, 0),
                             (pad_beg, pad_end), (pad_beg, pad_end)))
    Hp, Wp = H + pad_total, W + pad_total
    H_out = (Hp - k_eff) // stride + 1
    W_out = (Wp - k_eff) // stride + 1
    P = B * H_out * W_out

    # ---- im2col in the wrapper: channel-major, flattened spatial axis last ----
    taps = []
    for kh in range(KH):
        for kw in range(KW):
            h0, w0 = kh * dilation, kw * dilation
            slab = x_pad[:, :,
                         h0:h0 + (H_out - 1) * stride + 1:stride,
                         w0:w0 + (W_out - 1) * stride + 1:stride]
            taps.append(jnp.transpose(slab, (1, 0, 2, 3)).reshape(Cin, P))
    patches = jnp.stack(taps, axis=0).astype(jnp.float32)        # (T, Cin, P)

    # lane-dense padding of the flattened spatial axis + tile choice
    p_round = pl.cdiv(P, 128) * 128
    TP = min(max(int(tile_p), 128), p_round)
    TP = (TP // 128) * 128
    P_pad = pl.cdiv(P, TP) * TP
    if P_pad != P:
        # zero padding keeps the BN sums exact (we divide by the true P below)
        patches = jnp.pad(patches, ((0, 0), (0, 0), (0, P_pad - P)))
    num_tiles = P_pad // TP

    w_dw_b = jnp.transpose(w_dw.reshape(Cin, T), (1, 0)).reshape(T, Cin, 1)
    w_dw_b = w_dw_b.astype(jnp.float32)

    # ---- pass 1: depthwise conv + per-tile partial BN stats ----
    dw_out, psum, psumsq = pl.pallas_call(
        _make_dw_kernel(T),
        grid=(num_tiles,),
        in_specs=[
            pl.BlockSpec((T, Cin, TP), lambda i: (0, 0, i)),
            pl.BlockSpec((T, Cin, 1), lambda i: (0, 0, 0)),
        ],
        out_specs=[
            pl.BlockSpec((Cin, TP), lambda i: (0, i)),
            pl.BlockSpec((1, Cin, 1), lambda i: (i, 0, 0)),
            pl.BlockSpec((1, Cin, 1), lambda i: (i, 0, 0)),
        ],
        out_shape=[
            jax.ShapeDtypeStruct((Cin, P_pad), jnp.float32),
            jax.ShapeDtypeStruct((num_tiles, Cin, 1), jnp.float32),
            jax.ShapeDtypeStruct((num_tiles, Cin, 1), jnp.float32),
        ],
        compiler_params=pltpu.CompilerParams(
            dimension_semantics=("parallel",)),
    )(patches, w_dw_b)

    # ---- tiny glue (O(Cin*Cout)): global batch stats, fold BN into 1x1 conv ----
    s = jnp.sum(psum, axis=0).reshape(Cin)
    ss = jnp.sum(psumsq, axis=0).reshape(Cin)
    mean = s / P
    var = ss / P - mean * mean                  # biased var (training-mode BN)
    inv_std = jax.lax.rsqrt(var + eps)
    scale = gamma.astype(jnp.float32) * inv_std
    shift = beta.astype(jnp.float32) - mean * scale
    w_pw_mat = w_pw.reshape(Cout, Cin).astype(jnp.float32)
    w_eff = w_pw_mat * scale[None, :]                   # (Cout, Cin)
    bias_eff = (w_pw_mat @ shift).reshape(Cout, 1)      # (Cout, 1)

    # ---- pass 2: fused (BN-affine + pointwise conv) matmul per tile ----
    out_pad = pl.pallas_call(
        _pw_kernel,
        grid=(num_tiles,),
        in_specs=[
            pl.BlockSpec((Cin, TP), lambda i: (0, i)),
            pl.BlockSpec((Cout, Cin), lambda i: (0, 0)),
            pl.BlockSpec((Cout, 1), lambda i: (0, 0)),
        ],
        out_specs=pl.BlockSpec((Cout, TP), lambda i: (0, i)),
        out_shape=jax.ShapeDtypeStruct((Cout, P_pad), jnp.float32),
        compiler_params=pltpu.CompilerParams(
            dimension_semantics=("parallel",)),
    )(dw_out, w_eff, bias_eff)

    out = out_pad[:, :P].reshape(Cout, B, H_out, W_out)
    return jnp.transpose(out, (1, 0, 2, 3))             # back to NCHW


# ------------------------------- reference ----------------------------------
def _reference(x, w_dw, w_pw, gamma, beta, *, stride, dilation, eps=1e-5):
    """Pure-JAX reference: fixed_padding + grouped conv + BN(batch stats) + 1x1."""
    Cin = x.shape[1]
    KH = w_dw.shape[2]
    k_eff = KH + (KH - 1) * (dilation - 1)
    pad_total = k_eff - 1
    pad_beg = pad_total // 2
    pad_end = pad_total - pad_beg
    x_pad = jnp.pad(x, ((0, 0), (0, 0), (pad_beg, pad_end), (pad_beg, pad_end)))
    y = jax.lax.conv_general_dilated(
        x_pad, w_dw, window_strides=(stride, stride), padding="VALID",
        rhs_dilation=(dilation, dilation),
        dimension_numbers=("NCHW", "OIHW", "NCHW"),
        feature_group_count=Cin,
        precision=jax.lax.Precision.HIGHEST)
    mean = jnp.mean(y, axis=(0, 2, 3), keepdims=True)
    var = jnp.mean((y - mean) ** 2, axis=(0, 2, 3), keepdims=True)
    y = (y - mean) * jax.lax.rsqrt(var + eps) * gamma.reshape(1, -1, 1, 1) \
        + beta.reshape(1, -1, 1, 1)
    out = jax.lax.conv_general_dilated(
        y, w_pw, window_strides=(1, 1), padding="VALID",
        dimension_numbers=("NCHW", "OIHW", "NCHW"),
        precision=jax.lax.Precision.HIGHEST)
    return out


if __name__ == "__main__":
    # SeparableConv2d(inplanes=4, planes=8, kernel_size=3, stride=1, dilation=2)
    B, Cin, H, W = 2, 4, 16, 16
    Cout, K = 8, 3
    stride, dilation = 1, 2

    key = jax.random.PRNGKey(0)
    kx, k1, k2, k3, k4 = jax.random.split(key, 5)
    x = jax.random.normal(kx, (B, Cin, H, W), dtype=jnp.float32)
    w_dw = 0.3 * jax.random.normal(k1, (Cin, 1, K, K), dtype=jnp.float32)
    w_pw = 0.3 * jax.random.normal(k2, (Cout, Cin, 1, 1), dtype=jnp.float32)
    # BatchNorm affine params (defaults are 1/0; perturb to exercise the path)
    gamma = 1.0 + 0.1 * jax.random.normal(k3, (Cin,), dtype=jnp.float32)
    beta = 0.1 * jax.random.normal(k4, (Cin,), dtype=jnp.float32)

    out = separable_conv2d_forward(x, w_dw, w_pw, gamma, beta,
                                   stride=stride, dilation=dilation,
                                   tile_p=256)   # 2 grid steps at this shape
    out = jax.block_until_ready(out)

    ref = _reference(x, w_dw, w_pw, gamma, beta,
                     stride=stride, dilation=dilation)
    assert out.shape == (B, Cout, H, W)
    err = float(jnp.max(jnp.abs(out - ref)))
    assert err < 5e-4, f"mismatch vs JAX reference: {err}"

    print("KERNEL_OK")
</pallas_src>

<mosaic_0001>
module attributes {stable_mosaic.version = 11 : i64} {
  func.func @kernel(%arg0: i32, %arg1: memref<9x4x256xf32, #tpu.memory_space<vmem>>, %arg2: memref<9x4x1xf32, #tpu.memory_space<vmem>>, %arg3: memref<4x256xf32, #tpu.memory_space<vmem>>, %arg4: memref<1x4x1xf32, #tpu.memory_space<vmem>>, %arg5: memref<1x4x1xf32, #tpu.memory_space<vmem>>) attributes {dimension_semantics = [#tpu.dimension_semantics<parallel>], iteration_bounds = array<i64: 2>, scalar_prefetch = 0 : i64, scratch_operands = 0 : i64, tpu.core_type = #tpu.core_type<tc>, window_params = [{transform_indices = @transform_0, window_bounds = array<i64: 9, 4, 256>}, {pipeline_mode = #tpu.pipeline_mode<synchronous>, transform_indices = @transform_1, window_bounds = array<i64: 9, 4, 1>}, {transform_indices = @transform_2, window_bounds = array<i64: 4, 256>}, {transform_indices = @transform_3, window_bounds = array<i64: 1, 4, 1>}, {transform_indices = @transform_4, window_bounds = array<i64: 1, 4, 1>}]} {
    %c0 = arith.constant 0 : index
    %c0_0 = arith.constant 0 : index
    %c0_1 = arith.constant 0 : index
    %0 = vector.load %arg1[%c0, %c0_0, %c0_1] : memref<9x4x256xf32, #tpu.memory_space<vmem>>, vector<1x4x256xf32>
    %1 = vector.shape_cast %0 : vector<1x4x256xf32> to vector<4x256xf32>
    %c0_2 = arith.constant 0 : index
    %c0_3 = arith.constant 0 : index
    %c0_4 = arith.constant 0 : index
    %2 = vector.load %arg2[%c0_2, %c0_3, %c0_4] : memref<9x4x1xf32, #tpu.memory_space<vmem>>, vector<1x4x1xf32>
    %3 = vector.shape_cast %2 : vector<1x4x1xf32> to vector<4x1xf32>
    %4 = vector.broadcast %3 : vector<4x1xf32> to vector<4x256xf32>
    %5 = arith.mulf %1, %4 : vector<4x256xf32>
    %c1 = arith.constant 1 : index
    %c0_5 = arith.constant 0 : index
    %c0_6 = arith.constant 0 : index
    %6 = vector.load %arg1[%c1, %c0_5, %c0_6] : memref<9x4x256xf32, #tpu.memory_space<vmem>>, vector<1x4x256xf32>
    %7 = vector.shape_cast %6 : vector<1x4x256xf32> to vector<4x256xf32>
    %c1_7 = arith.constant 1 : index
    %c0_8 = arith.constant 0 : index
    %c0_9 = arith.constant 0 : index
    %8 = vector.load %arg2[%c1_7, %c0_8, %c0_9] : memref<9x4x1xf32, #tpu.memory_space<vmem>>, vector<1x4x1xf32>
    %9 = vector.shape_cast %8 : vector<1x4x1xf32> to vector<4x1xf32>
    %10 = vector.broadcast %9 : vector<4x1xf32> to vector<4x256xf32>
    %11 = arith.mulf %7, %10 : vector<4x256xf32>
    %12 = arith.addf %5, %11 : vector<4x256xf32>
    %c2 = arith.constant 2 : index
    %c0_10 = arith.constant 0 : index
    %c0_11 = arith.constant 0 : index
    %13 = vector.load %arg1[%c2, %c0_10, %c0_11] : memref<9x4x256xf32, #tpu.memory_space<vmem>>, vector<1x4x256xf32>
    %14 = vector.shape_cast %13 : vector<1x4x256xf32> to vector<4x256xf32>
    %c2_12 = arith.constant 2 : index
    %c0_13 = arith.constant 0 : index
    %c0_14 = arith.constant 0 : index
    %15 = vector.load %arg2[%c2_12, %c0_13, %c0_14] : memref<9x4x1xf32, #tpu.memory_space<vmem>>, vector<1x4x1xf32>
    %16 = vector.shape_cast %15 : vector<1x4x1xf32> to vector<4x1xf32>
    %17 = vector.broadcast %16 : vector<4x1xf32> to vector<4x256xf32>
    %18 = arith.mulf %14, %17 : vector<4x256xf32>
    %19 = arith.addf %12, %18 : vector<4x256xf32>
    %c3 = arith.constant 3 : index
    %c0_15 = arith.constant 0 : index
    %c0_16 = arith.constant 0 : index
    %20 = vector.load %arg1[%c3, %c0_15, %c0_16] : memref<9x4x256xf32, #tpu.memory_space<vmem>>, vector<1x4x256xf32>
    %21 = vector.shape_cast %20 : vector<1x4x256xf32> to vector<4x256xf32>
    %c3_17 = arith.constant 3 : index
    %c0_18 = arith.constant 0 : index
    %c0_19 = arith.constant 0 : index
    %22 = vector.load %arg2[%c3_17, %c0_18, %c0_19] : memref<9x4x1xf32, #tpu.memory_space<vmem>>, vector<1x4x1xf32>
    %23 = vector.shape_cast %22 : vector<1x4x1xf32> to vector<4x1xf32>
    %24 = vector.broadcast %23 : vector<4x1xf32> to vector<4x256xf32>
    %25 = arith.mulf %21, %24 : vector<4x256xf32>
    %26 = arith.addf %19, %25 : vector<4x256xf32>
    %c4 = arith.constant 4 : index
    %c0_20 = arith.constant 0 : index
    %c0_21 = arith.constant 0 : index
    %27 = vector.load %arg1[%c4, %c0_20, %c0_21] : memref<9x4x256xf32, #tpu.memory_space<vmem>>, vector<1x4x256xf32>
    %28 = vector.shape_cast %27 : vector<1x4x256xf32> to vector<4x256xf32>
    %c4_22 = arith.constant 4 : index
    %c0_23 = arith.constant 0 : index
    %c0_24 = arith.constant 0 : index
    %29 = vector.load %arg2[%c4_22, %c0_23, %c0_24] : memref<9x4x1xf32, #tpu.memory_space<vmem>>, vector<1x4x1xf32>
    %30 = vector.shape_cast %29 : vector<1x4x1xf32> to vector<4x1xf32>
    %31 = vector.broadcast %30 : vector<4x1xf32> to vector<4x256xf32>
    %32 = arith.mulf %28, %31 : vector<4x256xf32>
    %33 = arith.addf %26, %32 : vector<4x256xf32>
    %c5 = arith.constant 5 : index
    %c0_25 = arith.constant 0 : index
    %c0_26 = arith.constant 0 : index
    %34 = vector.load %arg1[%c5, %c0_25, %c0_26] : memref<9x4x256xf32, #tpu.memory_space<vmem>>, vector<1x4x256xf32>
    %35 = vector.shape_cast %34 : vector<1x4x256xf32> to vector<4x256xf32>
    %c5_27 = arith.constant 5 : index
    %c0_28 = arith.constant 0 : index
    %c0_29 = arith.constant 0 : index
    %36 = vector.load %arg2[%c5_27, %c0_28, %c0_29] : memref<9x4x1xf32, #tpu.memory_space<vmem>>, vector<1x4x1xf32>
    %37 = vector.shape_cast %36 : vector<1x4x1xf32> to vector<4x1xf32>
    %38 = vector.broadcast %37 : vector<4x1xf32> to vector<4x256xf32>
    %39 = arith.mulf %35, %38 : vector<4x256xf32>
    %40 = arith.addf %33, %39 : vector<4x256xf32>
    %c6 = arith.constant 6 : index
    %c0_30 = arith.constant 0 : index
    %c0_31 = arith.constant 0 : index
    %41 = vector.load %arg1[%c6, %c0_30, %c0_31] : memref<9x4x256xf32, #tpu.memory_space<vmem>>, vector<1x4x256xf32>
    %42 = vector.shape_cast %41 : vector<1x4x256xf32> to vector<4x256xf32>
    %c6_32 = arith.constant 6 : index
    %c0_33 = arith.constant 0 : index
    %c0_34 = arith.constant 0 : index
    %43 = vector.load %arg2[%c6_32, %c0_33, %c0_34] : memref<9x4x1xf32, #tpu.memory_space<vmem>>, vector<1x4x1xf32>
    %44 = vector.shape_cast %43 : vector<1x4x1xf32> to vector<4x1xf32>
    %45 = vector.broadcast %44 : vector<4x1xf32> to vector<4x256xf32>
    %46 = arith.mulf %42, %45 : vector<4x256xf32>
    %47 = arith.addf %40, %46 : vector<4x256xf32>
    %c7 = arith.constant 7 : index
    %c0_35 = arith.constant 0 : index
    %c0_36 = arith.constant 0 : index
    %48 = vector.load %arg1[%c7, %c0_35, %c0_36] : memref<9x4x256xf32, #tpu.memory_space<vmem>>, vector<1x4x256xf32>
    %49 = vector.shape_cast %48 : vector<1x4x256xf32> to vector<4x256xf32>
    %c7_37 = arith.constant 7 : index
    %c0_38 = arith.constant 0 : index
    %c0_39 = arith.constant 0 : index
    %50 = vector.load %arg2[%c7_37, %c0_38, %c0_39] : memref<9x4x1xf32, #tpu.memory_space<vmem>>, vector<1x4x1xf32>
    %51 = vector.shape_cast %50 : vector<1x4x1xf32> to vector<4x1xf32>
    %52 = vector.broadcast %51 : vector<4x1xf32> to vector<4x256xf32>
    %53 = arith.mulf %49, %52 : vector<4x256xf32>
    %54 = arith.addf %47, %53 : vector<4x256xf32>
    %c8 = arith.constant 8 : index
    %c0_40 = arith.constant 0 : index
    %c0_41 = arith.constant 0 : index
    %55 = vector.load %arg1[%c8, %c0_40, %c0_41] : memref<9x4x256xf32, #tpu.memory_space<vmem>>, vector<1x4x256xf32>
    %56 = vector.shape_cast %55 : vector<1x4x256xf32> to vector<4x256xf32>
    %c8_42 = arith.constant 8 : index
    %c0_43 = arith.constant 0 : index
    %c0_44 = arith.constant 0 : index
    %57 = vector.load %arg2[%c8_42, %c0_43, %c0_44] : memref<9x4x1xf32, #tpu.memory_space<vmem>>, vector<1x4x1xf32>
    %58 = vector.shape_cast %57 : vector<1x4x1xf32> to vector<4x1xf32>
    %59 = vector.broadcast %58 : vector<4x1xf32> to vector<4x256xf32>
    %60 = arith.mulf %56, %59 : vector<4x256xf32>
    %61 = arith.addf %54, %60 : vector<4x256xf32>
    %c0_45 = arith.constant 0 : index
    %c0_46 = arith.constant 0 : index
    %62 = vector.load %arg3[%c0_45, %c0_46] : memref<4x256xf32, #tpu.memory_space<vmem>>, vector<4x256xf32>
    tpu.vector_store %arg3[%c0_45, %c0_46], %61 {strides = array<i32>} : memref<4x256xf32, #tpu.memory_space<vmem>>, vector<4x256xf32>,
    %cst = arith.constant dense<0.000000e+00> : vector<4xf32>
    %63 = vector.multi_reduction <add>, %61, %cst [1] : vector<4x256xf32> to vector<4xf32>
    %64 = vector.shape_cast %63 : vector<4xf32> to vector<4x1xf32>
    %65 = vector.shape_cast %64 : vector<4x1xf32> to vector<1x4x1xf32>
    %c0_47 = arith.constant 0 : index
    %c0_48 = arith.constant 0 : index
    %c0_49 = arith.constant 0 : index
    %66 = vector.load %arg4[%c0_47, %c0_48, %c0_49] : memref<1x4x1xf32, #tpu.memory_space<vmem>>, vector<1x4x1xf32>
    tpu.vector_store %arg4[%c0_47, %c0_48, %c0_49], %65 {strides = array<i32>} : memref<1x4x1xf32, #tpu.memory_space<vmem>>, vector<1x4x1xf32>,
    %67 = arith.mulf %61, %61 : vector<4x256xf32>
    %cst_50 = arith.constant dense<0.000000e+00> : vector<4xf32>
    %68 = vector.multi_reduction <add>, %67, %cst_50 [1] : vector<4x256xf32> to vector<4xf32>
    %69 = vector.shape_cast %68 : vector<4xf32> to vector<4x1xf32>
    %70 = vector.shape_cast %69 : vector<4x1xf32> to vector<1x4x1xf32>
    %c0_51 = arith.constant 0 : index
    %c0_52 = arith.constant 0 : index
    %c0_53 = arith.constant 0 : index
    %71 = vector.load %arg5[%c0_51, %c0_52, %c0_53] : memref<1x4x1xf32, #tpu.memory_space<vmem>>, vector<1x4x1xf32>
    tpu.vector_store %arg5[%c0_51, %c0_52, %c0_53], %70 {strides = array<i32>} : memref<1x4x1xf32, #tpu.memory_space<vmem>>, vector<1x4x1xf32>,
    return
  }
  func.func @transform_0(%arg0: i32) -> (i32, i32, i32) {
    %c0_i32 = arith.constant 0 : i32
    %c0_i32_0 = arith.constant 0 : i32
    %c0_i32_1 = arith.constant 0 : i32
    return %c0_i32, %c0_i32_0, %arg0 : i32, i32, i32
  }
  func.func @transform_1(%arg0: i32) -> (i32, i32, i32) {
    %c0_i32 = arith.constant 0 : i32
    %c0_i32_0 = arith.constant 0 : i32
    %c0_i32_1 = arith.constant 0 : i32
    %c0_i32_2 = arith.constant 0 : i32
    return %c0_i32, %c0_i32_0, %c0_i32_1 : i32, i32, i32
  }
  func.func @transform_2(%arg0: i32) -> (i32, i32) {
    %c0_i32 = arith.constant 0 : i32
    %c0_i32_0 = arith.constant 0 : i32
    return %c0_i32, %arg0 : i32, i32
  }
  func.func @transform_3(%arg0: i32) -> (i32, i32, i32) {
    %c0_i32 = arith.constant 0 : i32
    %c0_i32_0 = arith.constant 0 : i32
    %c0_i32_1 = arith.constant 0 : i32
    return %arg0, %c0_i32, %c0_i32_0 : i32, i32, i32
  }
  func.func @transform_4(%arg0: i32) -> (i32, i32, i32) {
    %c0_i32 = arith.constant 0 : i32
    %c0_i32_0 = arith.constant 0 : i32
    %c0_i32_1 = arith.constant 0 : i32
    return %arg0, %c0_i32, %c0_i32_0 : i32, i32, i32
  }
}

</mosaic_0001>

<bundles_post_ra>
// kernel: tpu_custom_call.1
= control target key start
LH: loop header
LB: loop body
LE: loop exit
PB: predicated region body
PF: predicated region fallthrough
CT: control target
= control target key end

     0   :  { %10 = vsyncpa [#allocation3], 0  ;;  %s936_s0 = inlined_call_operand.hbm [shape: f32[9,4,512], index: 0, kind: input, shape index: {}]   ;;  %s937_s1 = inlined_call_operand.vmem [shape: f32[9,4,1], index: 1, kind: input, shape index: {}]   ;;  %s938_s2 = inlined_call_operand.hbm [shape: f32[4,512], index: 2, kind: output, shape index: {0}]   ;;  %s939_s3 = inlined_call_operand.vmem [shape: f32[2,4,1], index: 3, kind: output, shape index: {1}]   ;;  %s940_s4 = inlined_call_operand.vmem [shape: f32[2,4,1], index: 4, kind: output, shape index: {2}]  }
   0x1   :  { %12 = vsyncpa [#allocation3 + $0x1], 0 }
   0x2   :  { %13 = vsyncpa [#allocation4], 0 }
   0x3   :  { %15 = vsyncpa [#allocation4 + $0x1], 0  ;;  %s766_s15 = smov 0   ;;  %s768_s16 = smov 0  }
   0x4   :  { %s770_s17 = smov 0   ;;  %s772_s18 = smov 0  }
   0x5 LB: > { %s787_s19 = sadd.s32 4294967295, %s734_s18   ;;  %s550_s20 = sadd.s32 4294967294, %s734_s18   ;;  %s734_s18 = sphi %s772_s18, %s948_s18   ;;  %s730_s17 = sphi %s770_s17, %s947_s17   ;;  %s726_s16 = sphi %s768_s16, %s946_s16   ;;  %s722_s15 = sphi %s766_s15, %s945_s15  }
   0x6   : > { %s791_s21 = sadd.s32 1, %s734_s18   ;;  %s28_s22 = sadd.s32 1, %s730_s17 }
   0x7   : > { %s25_s23 = ssub.s32 %s734_s18, %s791_s21  ;;  %p35_p0 = scmp.ne.s32.totalorder %s730_s17, %s726_s16 }
   0x8   : > { %p26_p1 = scmp.eq.s32.totalorder %s25_s23, 0  ;;  %p36_p2 = scmp.eq.s32.totalorder %s734_s18, 0 }
   0x9   : > { %p41_p3 = scmp.ne.s32.totalorder %s726_s16, %s722_s15  ;;  %p42_p4 = scmp.eq.s32.totalorder %s787_s19, 0 }
   0xa   : > { %s803_s24 = scalar_select %p26_p1, %s730_s17, %s28_s22  }
   0xb   : > { %p37_p5 = por %p36_p2, %p35_p0  ;;  %p805_p6 = por %p42_p4, %p41_p3 }
   0xc   : > { %p86_p7 = scmp.eq.s32.totalorder %s787_s19, 1  ;;  %p92_p8 = scmp.eq.s32.totalorder %s550_s20, 1 }
   0xd   : > { %p552_p9 = scmp.ge.s32.totalorder %s734_s18, 2  ;;  %p596_p10 = scmp.lt.s32.totalorder %s734_s18, 2 }
   0xe   : > { %p812_p11 = por %p86_p7, %p35_p0  ;;  %p816_p12 = por %p92_p8, %p41_p3 }
   0xf   : > { %s167_s28 = sand.u32 1, %s730_s17   ;;  %s580_s29 = sshll.u32 %s734_s18, 3 }
  0x10   : > { %s582_s30 = smul.u32 72, %s167_s28  ;;  %s176_s7 = scalar_lea.hbm %s936_s0, %s580_s29 }
  0x11   : > { %p825_p13 = pnand %p596_p10, %p37_p5  ;;  %s177_s9 = sshll.u32 %s176_s7, 4  ;;  %s178_s9 = int_to_ptr.hbm [resolvable:$true] %s177_s9 }
  0x12   : > { %s171_s10 = scalar_lea.vmem [#allocation2], %s582_s30  ;;  %p555_p0 = scmp.ge.s32.totalorder %s734_s18, 1 }
  0x13   : > { %s179_s11 = sshll.u32 %s171_s10, 4  ;;  %s168_s12 = scalar_lea.sflag [#allocation3], %s167_s28  ;;  %s180_s11 = int_to_ptr.vmem [resolvable:$true] %s179_s11 }
  0x14   : > { %s638_s13 = sshra.s32 %s178_s9, 4  ;;  %p642_p2 = pneg %p825_p13  ;;  %s639_s13 = int_to_ptr.hbm [resolvable:$true] %s638_s13 }
  0x15   : > { %s640_s14 = scalar_lea.hbm %s639_s13, 72  ;;  %s645_s23 = scalar_lea.hbm %s936_s0, 144 }
  0x16   : > { %p641_p1 = scmp.ne.s32.totalorder %s639_s13, %s640_s14  ;;  %p646_p5 = scmp.lt.s32.totalorder %s639_s13, %s936_s0 }
  0x17   : > { %p647_p7 = scmp.lt.s32.totalorder %s645_s23, %s640_s14 }
  0x18   : > { %p643_p3 = pnand %p642_p2, %p641_p1 }
  0x19   : > { %p648_p8 = por %p647_p7, %p646_p5 }
  0x1a   : > { %p644_p4 = pneg %p643_p3 }
  0x1c   : > { %p649_p10 = pnand %p648_p8, %p644_p4 }
  0x1e   : > { %652 = shalt.err (!%p649_p10)
}
  0x1f   : > { %s736_s28 = smov 256   ;;  %s737_s30 = smov 128  }
  0x20   : > { %s738_s6 = smov 8   ;;  %p187_p1 = scmp.lt.s32.totalorder %s734_s18, 3 }
  0x21   : > { %591 = dma.hbm_to_vmem [thread:$0]  (!%p825_p13), %s178_s9, 1152, %s180_s11, %s168_s12, %s736_s28, %s737_s30, %s738_s6  }
  0x22   : > { %p188_p2 = pnand %p555_p0, %p187_p1 }
  0x23   : > { %s844_s7 = sand.u32 (!%p188_p2), 1, %s726_s16  }
  0x24   : > { %191 = sbr.rel (%p188_p2) target bundleno = 324 (0x144), region = 28  ;;  %s194_s13 = scalar_lea.sflag (!%p188_p2), [#allocation3], %s844_s7 }
  0x25   : > { %s583_s10 = smul.u32 (!%p188_p2), 72, %s844_s7 }
  0x27   : > { %s848_s14 = scalar_lea.vmem (!%p188_p2), [#allocation2], %s583_s10 }
  0x29   : > { %713 = dma.done.wait (%p805_p6), %s194_s13, 1152  }
  0x2a   : > { %715 = vsyncadd (%p805_p6), %s194_s13, 4294966144  ;;  %v739_v0 = vmov 0   ;;  %v562_v1 = vld [vmem:[%s937_s1 + $0x8] sm:$0xf]  ;;  %v242_v2 = vld [vmem:[%s937_s1] sm:$0xf] }
  0x2b   : > { %636 = vset.pattern.permute.xlu1 %v739_v0  ;;  %635 = vset.pattern.permute.xlu0 %v739_v0  ;;  %v566_v3 = vld [vmem:[%s937_s1 + $0x10] sm:$0xf]  ;;  %v564_v4 = vld [vmem:[%s937_s1 + $0xc] sm:$0xf]  ;;  %v560_v5 = vld [vmem:[%s937_s1 + $0x4] sm:$0xf] }
  0x2c   : > { %637 = vset.pattern.permute.xlu2 %v739_v0  ;;  %274 = vperm.xlu1 %636, %v562_v1   ;;  %v568_v6 = vld [vmem:[%s937_s1 + $0x14] sm:$0xf]  ;;  %v572_v7 = vld [vmem:[%s937_s1 + $0x1c] sm:$0xf]  ;;  %v570_v8 = vld [vmem:[%s937_s1 + $0x18] sm:$0xf] }
  0x2d   : > { %245 = vperm.xlu0 %635, %v242_v2   ;;  %304 = vperm.xlu2 %637, %v566_v3   ;;  %v574_v9 = vld [vmem:[%s937_s1 + $0x20] sm:$0xf]  ;;  %v740_v11 = vmov 839922192   ;;  %v241_v18 = vld [vmem:[%s848_s14] sm:$0xff]  ;;  %v559_v20 = vld [vmem:[%s848_s14 + $0x8] sm:$0xff] }
  0x2e   : > { %v248_v12 = vunpack.c.l.s4 %v740_v11  ;;  %v561_v24 = vld [vmem:[%s848_s14 + $0x10] sm:$0xff]  ;;  %v563_v28 = vld [vmem:[%s848_s14 + $0x18] sm:$0xff]  ;;  %v565_v32 = vld [vmem:[%s848_s14 + $0x20] sm:$0xff]  ;;  %s556_s12 = sshll.u32 %s844_s7, 3  ;;  %s581_s22 = sshll.u32 %s787_s19, 3  ;;  %vm380_vm0 = vcmask 1043456  }
  0x2f   : > { %v567_v36 = vld [vmem:[%s848_s14 + $0x28] sm:$0xff]  ;;  %v569_v43 = vld [vmem:[%s848_s14 + $0x30] sm:$0xff]  ;;  %v571_v47 = vld [vmem:[%s848_s14 + $0x38] sm:$0xff]  ;;  %s218_s20 = scalar_lea.vmem [#allocation5], %s556_s12  ;;  %s421_s29 = scalar_lea.hbm %s938_s2, %s581_s22 }
  0x30   : > { %v249_v15 = vunpack.c.0.s8 %v248_v12  ;;  %v573_v51 = vld [vmem:[%s848_s14 + $0x40] sm:$0xff]  ;;  %s423_s5 = sshll.u32 %s218_s20, 4  ;;  %s425_s14 = sshll.u32 %s421_s29, 4  ;;  %s424_s5 = int_to_ptr.vmem [resolvable:$true] %s423_s5  ;;  %s426_s14 = int_to_ptr.hbm [resolvable:$true] %s425_s14 }
  0x31   : > { %s402_s28 = scalar_lea.sflag [#allocation4], %s844_s7  ;;  %s682_s30 = sshra.s32 %s426_s14, 4  ;;  %s683_s30 = int_to_ptr.hbm [resolvable:$true] %s682_s30 }
  0x32   : > { %s684_s6 = scalar_lea.hbm %s683_s30, 8  ;;  %s688_s8 = scalar_lea.hbm %s938_s2, 16 }
  0x33   : > { %p685_p6 = scmp.ne.s32.totalorder %s683_s30, %s684_s6  ;;  %p689_p3 = scmp.lt.s32.totalorder %s683_s30, %s938_s2 }
  0x34   : > { %289 = vperm.xlu1 %636, %v564_v4   ;;  %p690_p4 = scmp.lt.s32.totalorder %s688_s8, %s684_s6 }
  0x35   : > { %259 = vperm.xlu0 %635, %v560_v5   ;;  %319 = vperm.xlu2 %637, %v568_v6   ;;  %p686_p13 = pnand %p685_p6, %p812_p11 }
  0x36   : > { %p691_p5 = por %p690_p4, %p689_p3 }
  0x37   : > { %p687_p0 = pneg %p686_p13 }
  0x39   : > { %p692_p7 = pnand %p691_p5, %p687_p0 }
  0x3c   : > { %349 = vperm.xlu1 %636, %v572_v7  }
  0x3d   : > { %334 = vperm.xlu0 %635, %v570_v8   ;;  %364 = vperm.xlu2 %637, %v574_v9  }
  0x87   : > { %v305_v10 = vpop.permute.xlu2 %304 }
  0x88   : > { %v309_v29 = vperm.slane %v305_v10, %v249_v15 }
  0x8a   : > { %v311_v39 = vmul.f32 %v565_v32, %v309_v29 }
  0x8f   : > { %v320_v16 = vpop.permute.xlu2 %319 }
  0x90   : > { %v324_v33 = vperm.slane %v320_v16, %v249_v15 }
  0x92   : > { %v326_v44 = vmul.f32 %v567_v36, %v324_v33 }
  0x97   : > { %v365_v42 = vpop.permute.xlu2 %364 }
  0x98   : > { %v369_v48 = vperm.slane %v365_v42, %v249_v15 }
  0x9a   : > { %v371_v54 = vmul.f32 %v573_v51, %v369_v48 }
  0x9e   : > { %v275_v13 = vpop.permute.xlu1 %274 }
  0x9f   : > { %v246_v14 = vpop.permute.xlu0 %245  ;;  %v279_v22 = vperm.slane %v275_v13, %v249_v15 }
  0xa0   : > { %v250_v17 = vperm.slane %v246_v14, %v249_v15 }
  0xa1   : > { %v281_v30 = vmul.f32 %v561_v24, %v279_v22 }
  0xa2   : > { %v252_v25 = vmul.f32 %v250_v17, %v241_v18 }
  0xa6   : > { %v290_v19 = vpop.permute.xlu1 %289 }
  0xa7   : > { %v260_v21 = vpop.permute.xlu0 %259  ;;  %v294_v26 = vperm.slane %v290_v19, %v249_v15 }
  0xa8   : > { %v264_v23 = vperm.slane %v260_v21, %v249_v15 }
  0xa9   : > { %v296_v34 = vmul.f32 %v563_v28, %v294_v26 }
  0xaa   : > { %v266_v27 = vmul.f32 %v559_v20, %v264_v23 }
  0xac   : > { %v267_v31 = vadd.f32 %v266_v27, %v252_v25 }
  0xae   : > { %v282_v35 = vadd.f32 %v281_v30, %v267_v31  ;;  %v350_v37 = vpop.permute.xlu1 %349 }
  0xaf   : > { %v335_v38 = vpop.permute.xlu0 %334  ;;  %v354_v45 = vperm.slane %v350_v37, %v249_v15 }
  0xb0   : > { %v297_v40 = vadd.f32 %v296_v34, %v282_v35  ;;  %v339_v41 = vperm.slane %v335_v38, %v249_v15 }
  0xb1   : > { %v356_v52 = vmul.f32 %v571_v47, %v354_v45 }
  0xb2   : > { %v312_v46 = vadd.f32 %v311_v39, %v297_v40  ;;  %v341_v50 = vmul.f32 %v569_v43, %v339_v41 }
  0xb4   : > { %v327_v49 = vadd.f32 %v326_v44, %v312_v46 }
  0xb6   : > { %v342_v53 = vadd.f32 %v341_v50, %v327_v49 }
  0xb8   : > { %v357_v55 = vadd.f32 %v356_v52, %v342_v53 }
  0xba   : > { %v372_v56 = vadd.f32 %v371_v54, %v357_v55 }
  0xbc   : > { %375 = vst [vmem:[#allocation1] ss:$2 sm:$0xff] %v372_v56  ;;  %v388_v57 = vmul.f32 %v372_v56, %v372_v56 }
  0xbd   : > { %373 = vst [vmem:[%s218_s20] sm:$0xff] %v372_v56 }
  0xc3   : > { %v376_v58 = vld.sshfl [vmem:[#allocation1] sm:$0xff pattern:$0x75316420]  ;;  %v377_v59 = vld.sshfl [vmem:[#allocation1 + $0x8] sm:$0xff pattern:$0x75316420] }
  0xc4   : > { %v381_v60 = vsel %vm380_vm0, %v376_v58, 0.0  ;;  %v382_v61 = vsel %vm380_vm0, %v377_v59, 0.0  ;;  %390 = vst [vmem:[#allocation1] ss:$2 sm:$0xff] %v388_v57 }
  0xc5   : > { %v383_v62 = vadd.f32 %v382_v61, %v381_v60 }
  0xc6   : > { %695 = shalt.err (!%p692_p7)
}
  0xc7   : > { %586 = dma.vmem_to_hbm [thread:$0]  (%p812_p11), %s424_s5, 128, %s426_s14, %s402_s28   ;;  %384 = vadd.xlane.f32.xlu0 %v383_v62  ;;  %vm386_vm1 = vcmask 3072  }
  0xc8   : > { %p233_p8 = scmp.lt.s32.totalorder %s787_s19, 1 }
  0xca   : > { %s950_s19 = smov (!%p233_p8, %s787_s19), 1 }
  0xcb   : > { %v391_v63 = vld.sshfl [vmem:[#allocation1] sm:$0xff pattern:$0x75316420]  ;;  %v392_v0 = vld.sshfl [vmem:[#allocation1 + $0x8] sm:$0xff pattern:$0x75316420] }
  0xcc   : > { %v395_v1 = vsel %vm380_vm0, %v391_v63, 0.0  ;;  %v396_v2 = vsel %vm380_vm0, %v392_v0, 0.0  ;;  %s557_s7 = sshll.u32 %s950_s19, 2 }
  0xcd   : > { %v397_v3 = vadd.f32 %v396_v2, %v395_v1  ;;  %s236_s22 = scalar_lea.vmem %s939_s3, %s557_s7  ;;  %s240_s23 = scalar_lea.vmem %s940_s4, %s557_s7 }
  0xcf   : > { %398 = vadd.xlane.f32.xlu1 %v397_v3 }
 0x13a   : > { %v385_v4 = vpop.xlane.xlu0 %384 }
 0x13b   : > { %387 = vst.msk [vmem:[%s236_s22] sm:$0xf] %vm386_vm1, %v385_v4 }
 0x142   : > { %v399_v5 = vpop.xlane.xlu1 %398 }
 0x143   : > { %400 = vst.msk [vmem:[%s240_s23] sm:$0xf] %vm386_vm1, %v399_v5 }
 0x144 PF: > { %s443_s29 = sand.u32 1, %s722_s15   ;;  %p593_p11 = pnand %p552_p9, %p816_p12 }
 0x145   : > { %s444_s19 = scalar_lea.sflag [#allocation4], %s443_s29 }
 0x146   : > { %p594_p10 = pneg %p593_p11 }
 0x148   : > { %717 = dma.done.wait (%p594_p10), %s444_s19, 128  }
 0x149   : > { %719 = vsyncadd (%p594_p10), %s444_s19, 4294967168  ;;  %p18_p1 = scmp.ge.s32.totalorder %s791_s21, 4   ;;  %s945_s15 = smov %s726_s16 }
 0x14a   : > { %s946_s16 = smov %s730_s17  ;;  %s947_s17 = smov %s803_s24 }
 0x14b   : > { %s948_s18 = smov %s791_s21  ;;  %20 = sbr.rel (!%p18_p1) target bundleno = 5 (0x5), region = 113 }
 0x150   :  { %464 = vsyncpa [#allocation3], 1 }
 0x151   :  { %466 = vsyncpa [#allocation3 + $0x1], 1 }
 0x152   :  { %467 = vsyncpa [#allocation4], 1 }
 0x153   :  { %469 = vsyncpa [#allocation4 + $0x1], 1 }

</bundles_post_ra>
